<compile_context>
chip_gen: v7x
topology: tpu7x:2x2x1
jax: 0.10.0
libtpu: 0.0.40
codegen_flags: <defaults>
</compile_context>

<pallas_src>
import functools

import jax
import jax.numpy as jnp
from jax.experimental import pallas as pl
from jax.experimental.pallas import tpu as pltpu

BN_EPS = 1e-5


def _round_up(x, m):
    return (x + m - 1) // m * m


def _keypoint_encoder_kernel(
    kp_ref,                # (2, TILE_N)  bf16   keypoint coords, channels-first
    sc_ref,                # (1, TILE_N)  bf16   detection scores row
    w1_ref, b1_ref,        # (C1, 3) f32, (C1, 1) f32   BN-folded conv 1 (VPU path)
    w2_ref, b2_ref,        # (C2, C1) bf16, (C2, 1) f32 BN-folded conv 2
    w3_ref, b3_ref,        # (F, C2) bf16, (F, 1) f32   final conv (no BN / ReLU)
    o_ref,                 # (F, TILE_N)  bf16
):
    kx = kp_ref[0:1, :]                       # (1, TN) bf16
    ky = kp_ref[1:2, :]                       # (1, TN) bf16
    s = sc_ref[...]                           # (1, TN) bf16
    w1 = w1_ref[...]                          # (C1, 3) f32

    # layer 1: Conv1d(3 -> C1, k=1) [+ folded BN] + ReLU.
    # K=3 contraction done as VPU broadcast-multiply-adds (f32 accumulation).
    h = (w1[:, 0:1] * kx + w1[:, 1:2] * ky + w1[:, 2:3] * s) + b1_ref[...]
    h = jnp.maximum(h, 0.0).astype(jnp.bfloat16)                     # (C1, TN)

    # layer 2: Conv1d(C1 -> C2, k=1) [+ folded BN] + ReLU (MXU, f32 acc).
    h = jnp.dot(w2_ref[...], h, preferred_element_type=jnp.float32) + b2_ref[...]
    h = jnp.maximum(h, 0.0).astype(jnp.bfloat16)                     # (C2, TN)

    # layer 3: Conv1d(C2 -> F, k=1), bias (init 0), no BN / ReLU.
    y = jnp.dot(w3_ref[...], h, preferred_element_type=jnp.float32) + b3_ref[...]

    o_ref[...] = y.astype(o_ref.dtype)                               # (F, TN) lane-dense


def fold_bn_params(params):
    """Fold eval-mode BatchNorm into the preceding Conv1d(k=1) weights/biases.

    Returns: w1 (C1,3) f32, b1 (C1,1) f32,
             w2 (C2,C1) bf16, b2 (C2,1) f32,
             w3 (F,C2)  bf16, b3 (F,1)  f32.
    """
    (w1, b1, g1, be1, m1, v1,
     w2, b2, g2, be2, m2, v2,
     w3, b3) = params

    s1 = g1 * jax.lax.rsqrt(v1 + BN_EPS)
    w1f = (w1 * s1[:, None]).astype(jnp.float32)
    b1f = ((b1 - m1) * s1 + be1).astype(jnp.float32)[:, None]

    s2 = g2 * jax.lax.rsqrt(v2 + BN_EPS)
    w2f = (w2 * s2[:, None]).astype(jnp.bfloat16)
    b2f = ((b2 - m2) * s2 + be2).astype(jnp.float32)[:, None]

    return (w1f, b1f,
            w2f, b2f,
            w3.astype(jnp.bfloat16), b3.astype(jnp.float32)[:, None])


def keypoint_encoder(kpts, scores, params, *, tile_n=1024, out_dtype=jnp.bfloat16):
    """kpts: (B, N, 2), scores: (B, N) -> (B, feature_dim, N) (PyTorch NCL layout)."""
    B, N, _ = kpts.shape

    w1, b1, w2, b2, w3, b3 = fold_bn_params(params)
    C2, C1 = w2.shape
    F = w3.shape[0]

    # Lane-friendly tile selection + padding for ragged N.
    n_pad = _round_up(N, 128)
    TILE_N = min(tile_n, n_pad)
    n_pad = _round_up(n_pad, TILE_N)
    # v7x: make sure >=2 parallel blocks exist so both TensorCores get work.
    if B * (n_pad // TILE_N) < 2 and TILE_N % 256 == 0:
        TILE_N //= 2
    assert n_pad % TILE_N == 0

    # bf16 input streams; no (B,3,N) concat materialization.
    kpts_t = jnp.transpose(kpts, (0, 2, 1)).astype(jnp.bfloat16)      # (B, 2, N)
    scores_r = scores.reshape(B, 1, N).astype(jnp.bfloat16)           # (B, 1, N)
    if n_pad != N:
        pad = n_pad - N
        kpts_t = jnp.pad(kpts_t, ((0, 0), (0, 0), (0, pad)))
        scores_r = jnp.pad(scores_r, ((0, 0), (0, 0), (0, pad)))

    grid = (B, n_pad // TILE_N)

    full = lambda a: pl.BlockSpec(a.shape, lambda b, nt: (0, 0))

    cost = pl.CostEstimate(
        flops=2 * B * n_pad * (3 * C1 + C1 * C2 + C2 * F),
        transcendentals=0,
        bytes_accessed=2 * B * n_pad * (3 + F)                      # bf16 streams
        + (C1 * 3 + C1 + C2 + F) * 4 + (C1 * C2 + C2 * F) * 2,      # params
    )

    out = pl.pallas_call(
        _keypoint_encoder_kernel,
        out_shape=jax.ShapeDtypeStruct((B, F, n_pad), out_dtype),
        grid=grid,
        in_specs=[
            pl.BlockSpec((pl.Squeezed(), 2, TILE_N), lambda b, nt: (b, 0, nt)),
            pl.BlockSpec((pl.Squeezed(), 1, TILE_N), lambda b, nt: (b, 0, nt)),
            full(w1), full(b1),
            full(w2), full(b2),
            full(w3), full(b3),
        ],
        out_specs=pl.BlockSpec((pl.Squeezed(), F, TILE_N), lambda b, nt: (b, 0, nt)),
        compiler_params=pltpu.CompilerParams(
            dimension_semantics=("parallel", "parallel")),
        cost_estimate=cost,
    )(kpts_t, scores_r, w1, b1, w2, b2, w3, b3)

    if n_pad != N:
        out = out[:, :, :N]
    return out                                                        # (B, F, N)


def init_params(key, layers, feature_dim):
    """Deterministic synthetic parameters, PyTorch-style shapes.
    Channels: [3] + layers + [feature_dim]; conv weights are (Cout, Cin)."""
    chans = [3] + list(layers) + [feature_dim]
    c0, c1, c2, c3 = chans
    ks = jax.random.split(key, 8)

    def conv_w(k, cin, cout, scale=0.1):
        return (scale * jax.random.normal(k, (cout, cin))).astype(jnp.float32)

    def vec(k, c, scale=0.1):
        return (scale * jax.random.normal(k, (c,))).astype(jnp.float32)

    w1 = conv_w(ks[0], c0, c1); b1 = vec(ks[1], c1)
    g1 = jnp.ones((c1,), jnp.float32) + vec(ks[2], c1, 0.05)
    be1 = vec(ks[3], c1, 0.05)
    m1 = vec(ks[4], c1, 0.05)
    v1 = jnp.ones((c1,), jnp.float32) + jnp.abs(vec(ks[5], c1, 0.05))

    ks2 = jax.random.split(ks[6], 8)
    w2 = conv_w(ks2[0], c1, c2); b2 = vec(ks2[1], c2)
    g2 = jnp.ones((c2,), jnp.float32) + vec(ks2[2], c2, 0.05)
    be2 = vec(ks2[3], c2, 0.05)
    m2 = vec(ks2[4], c2, 0.05)
    v2 = jnp.ones((c2,), jnp.float32) + jnp.abs(vec(ks2[5], c2, 0.05))

    w3 = conv_w(ks[7], c2, c3)
    b3 = jnp.zeros((c3,), jnp.float32)    # nn.init.constant_(encoder[-1].bias, 0.0)

    return (w1, b1, g1, be1, m1, v1,
            w2, b2, g2, be2, m2, v2,
            w3, b3)


def _reference(kpts, scores, params):
    """Pure-JAX f32 reference (un-folded BN, eval mode)."""
    (w1, b1, g1, be1, m1, v1, w2, b2, g2, be2, m2, v2, w3, b3) = params
    x = jnp.concatenate([kpts, scores[..., None]], axis=-1).astype(jnp.float32)  # (B,N,3)
    h = x @ w1.T + b1
    h = (h - m1) * (g1 / jnp.sqrt(v1 + BN_EPS)) + be1
    h = jnp.maximum(h, 0.0)
    h = h @ w2.T + b2
    h = (h - m2) * (g2 / jnp.sqrt(v2 + BN_EPS)) + be2
    h = jnp.maximum(h, 0.0)
    y = h @ w3.T + b3
    return jnp.transpose(y, (0, 2, 1))                                            # (B,F,N)


if __name__ == "__main__":
    key = jax.random.PRNGKey(0)
    layers_cfg = [16, 32]
    feature_dim = 32
    k_kpts, k_scores, k_params = jax.random.split(key, 3)
    params = init_params(k_params, layers_cfg, feature_dim)

    enc = jax.jit(functools.partial(keypoint_encoder, params=params))

    # Case 1: lane-aligned N, B=2 -> grid (2, 1), both axes parallel.
    B, N = 2, 1024
    kpts = jax.random.uniform(k_kpts, (B, N, 2), jnp.float32)       # (x, y) coords
    scores = jax.random.uniform(k_scores, (B, N), jnp.float32)      # detection scores
    out = jax.block_until_ready(enc(kpts, scores))
    assert out.shape == (B, feature_dim, N), out.shape
    assert out.dtype == jnp.bfloat16, out.dtype
    ref = _reference(kpts, scores, params)
    assert jnp.allclose(out.astype(jnp.float32), ref, atol=2e-2, rtol=2e-2)

    # Case 2: ragged N, B=1 -> exercises padding + tile split (two parallel blocks).
    B2, N2 = 1, 1000
    kpts2 = jax.random.uniform(jax.random.PRNGKey(1), (B2, N2, 2), jnp.float32)
    scores2 = jax.random.uniform(jax.random.PRNGKey(2), (B2, N2), jnp.float32)
    out2 = jax.block_until_ready(enc(kpts2, scores2))
    assert out2.shape == (B2, feature_dim, N2), out2.shape
    ref2 = _reference(kpts2, scores2, params)
    assert jnp.allclose(out2.astype(jnp.float32), ref2, atol=2e-2, rtol=2e-2)

    print("KERNEL_OK")
</pallas_src>

<mosaic_0001>
module attributes {stable_mosaic.version = 11 : i64} {
  func.func @_keypoint_encoder_kernel(%arg0: i32, %arg1: i32, %arg2: memref<1x2x1024xbf16, #tpu.memory_space<vmem>>, %arg3: memref<1x1x1024xbf16, #tpu.memory_space<vmem>>, %arg4: memref<16x3xf32, #tpu.memory_space<vmem>>, %arg5: memref<16x1xf32, #tpu.memory_space<vmem>>, %arg6: memref<32x16xbf16, #tpu.memory_space<vmem>>, %arg7: memref<32x1xf32, #tpu.memory_space<vmem>>, %arg8: memref<32x32xbf16, #tpu.memory_space<vmem>>, %arg9: memref<32x1xf32, #tpu.memory_space<vmem>>, %arg10: memref<1x32x1024xbf16, #tpu.memory_space<vmem>>) attributes {dimension_semantics = [#tpu.dimension_semantics<parallel>, #tpu.dimension_semantics<parallel>], iteration_bounds = array<i64: 2, 1>, scalar_prefetch = 0 : i64, scratch_operands = 0 : i64, tpu.core_type = #tpu.core_type<tc>, window_params = [{transform_indices = @transform_0, window_bounds = array<i64: 1, 2, 1024>}, {transform_indices = @transform_1, window_bounds = array<i64: 1, 1, 1024>}, {pipeline_mode = #tpu.pipeline_mode<synchronous>, transform_indices = @transform_2, window_bounds = array<i64: 16, 3>}, {pipeline_mode = #tpu.pipeline_mode<synchronous>, transform_indices = @transform_3, window_bounds = array<i64: 16, 1>}, {pipeline_mode = #tpu.pipeline_mode<synchronous>, transform_indices = @transform_4, window_bounds = array<i64: 32, 16>}, {pipeline_mode = #tpu.pipeline_mode<synchronous>, transform_indices = @transform_5, window_bounds = array<i64: 32, 1>}, {pipeline_mode = #tpu.pipeline_mode<synchronous>, transform_indices = @transform_6, window_bounds = array<i64: 32, 32>}, {pipeline_mode = #tpu.pipeline_mode<synchronous>, transform_indices = @transform_7, window_bounds = array<i64: 32, 1>}, {transform_indices = @transform_8, window_bounds = array<i64: 1, 32, 1024>}]} {
    %c0 = arith.constant 0 : index
    %c0_0 = arith.constant 0 : index
    %c0_1 = arith.constant 0 : index
    %0 = vector.load %arg2[%c0, %c0_0, %c0_1] : memref<1x2x1024xbf16, #tpu.memory_space<vmem>>, vector<1x1x1024xbf16>
    %1 = vector.shape_cast %0 : vector<1x1x1024xbf16> to vector<1x1024xbf16>
    %c0_2 = arith.constant 0 : index
    %c1 = arith.constant 1 : index
    %c0_3 = arith.constant 0 : index
    %2 = vector.load %arg2[%c0_2, %c1, %c0_3] : memref<1x2x1024xbf16, #tpu.memory_space<vmem>>, vector<1x1x1024xbf16>
    %3 = vector.shape_cast %2 : vector<1x1x1024xbf16> to vector<1x1024xbf16>
    %c0_4 = arith.constant 0 : index
    %c0_5 = arith.constant 0 : index
    %c0_6 = arith.constant 0 : index
    %4 = vector.load %arg3[%c0_4, %c0_5, %c0_6] : memref<1x1x1024xbf16, #tpu.memory_space<vmem>>, vector<1x1x1024xbf16>
    %5 = vector.shape_cast %4 : vector<1x1x1024xbf16> to vector<1x1024xbf16>
    %c0_7 = arith.constant 0 : index
    %c0_8 = arith.constant 0 : index
    %6 = vector.load %arg4[%c0_7, %c0_8] : memref<16x3xf32, #tpu.memory_space<vmem>>, vector<16x3xf32>
    %7 = vector.extract_strided_slice %6 {offsets = [0, 0], sizes = [16, 1], strides = [1, 1]} : vector<16x3xf32> to vector<16x1xf32>
    %8 = arith.extf %1 : vector<1x1024xbf16> to vector<1x1024xf32>
    %9 = vector.broadcast %7 : vector<16x1xf32> to vector<16x1024xf32>
    %10 = vector.broadcast %8 : vector<1x1024xf32> to vector<16x1024xf32>
    %11 = arith.mulf %9, %10 : vector<16x1024xf32>
    %12 = vector.extract_strided_slice %6 {offsets = [0, 1], sizes = [16, 1], strides = [1, 1]} : vector<16x3xf32> to vector<16x1xf32>
    %13 = arith.extf %3 : vector<1x1024xbf16> to vector<1x1024xf32>
    %14 = vector.broadcast %12 : vector<16x1xf32> to vector<16x1024xf32>
    %15 = vector.broadcast %13 : vector<1x1024xf32> to vector<16x1024xf32>
    %16 = arith.mulf %14, %15 : vector<16x1024xf32>
    %17 = arith.addf %11, %16 : vector<16x1024xf32>
    %18 = vector.extract_strided_slice %6 {offsets = [0, 2], sizes = [16, 1], strides = [1, 1]} : vector<16x3xf32> to vector<16x1xf32>
    %19 = arith.extf %5 : vector<1x1024xbf16> to vector<1x1024xf32>
    %20 = vector.broadcast %18 : vector<16x1xf32> to vector<16x1024xf32>
    %21 = vector.broadcast %19 : vector<1x1024xf32> to vector<16x1024xf32>
    %22 = arith.mulf %20, %21 : vector<16x1024xf32>
    %23 = arith.addf %17, %22 : vector<16x1024xf32>
    %c0_9 = arith.constant 0 : index
    %c0_10 = arith.constant 0 : index
    %24 = vector.load %arg5[%c0_9, %c0_10] : memref<16x1xf32, #tpu.memory_space<vmem>>, vector<16x1xf32>
    %25 = vector.broadcast %24 : vector<16x1xf32> to vector<16x1024xf32>
    %26 = arith.addf %23, %25 : vector<16x1024xf32>
    %cst = arith.constant 0.000000e+00 : f32
    %27 = vector.broadcast %cst : f32 to vector<16x1024xf32>
    %28 = arith.maximumf %26, %27 : vector<16x1024xf32>
    %29 = arith.truncf %28 : vector<16x1024xf32> to vector<16x1024xbf16>
    %c0_11 = arith.constant 0 : index
    %c0_12 = arith.constant 0 : index
    %30 = vector.load %arg6[%c0_11, %c0_12] : memref<32x16xbf16, #tpu.memory_space<vmem>>, vector<32x16xbf16>
    %cst_13 = arith.constant dense<0.000000e+00> : vector<32x1024xf32>
    %31 = tpu.matmul %30, %29, %cst_13 {dimension_numbers = #tpu.dot_dimension_numbers<[1], [0], [0], [1], [0, 0, 1, 1], [], []>} : vector<32x16xbf16>, vector<16x1024xbf16>, vector<32x1024xf32> -> vector<32x1024xf32>
    %c0_14 = arith.constant 0 : index
    %c0_15 = arith.constant 0 : index
    %32 = vector.load %arg7[%c0_14, %c0_15] : memref<32x1xf32, #tpu.memory_space<vmem>>, vector<32x1xf32>
    %33 = vector.broadcast %32 : vector<32x1xf32> to vector<32x1024xf32>
    %34 = arith.addf %31, %33 : vector<32x1024xf32>
    %cst_16 = arith.constant 0.000000e+00 : f32
    %35 = vector.broadcast %cst_16 : f32 to vector<32x1024xf32>
    %36 = arith.maximumf %34, %35 : vector<32x1024xf32>
    %37 = arith.truncf %36 : vector<32x1024xf32> to vector<32x1024xbf16>
    %c0_17 = arith.constant 0 : index
    %c0_18 = arith.constant 0 : index
    %38 = vector.load %arg8[%c0_17, %c0_18] : memref<32x32xbf16, #tpu.memory_space<vmem>>, vector<32x32xbf16>
    %cst_19 = arith.constant dense<0.000000e+00> : vector<32x1024xf32>
    %39 = tpu.matmul %38, %37, %cst_19 {dimension_numbers = #tpu.dot_dimension_numbers<[1], [0], [0], [1], [0, 0, 1, 1], [], []>} : vector<32x32xbf16>, vector<32x1024xbf16>, vector<32x1024xf32> -> vector<32x1024xf32>
    %c0_20 = arith.constant 0 : index
    %c0_21 = arith.constant 0 : index
    %40 = vector.load %arg9[%c0_20, %c0_21] : memref<32x1xf32, #tpu.memory_space<vmem>>, vector<32x1xf32>
    %41 = vector.broadcast %40 : vector<32x1xf32> to vector<32x1024xf32>
    %42 = arith.addf %39, %41 : vector<32x1024xf32>
    %43 = arith.truncf %42 : vector<32x1024xf32> to vector<32x1024xbf16>
    %c0_22 = arith.constant 0 : index
    %c0_23 = arith.constant 0 : index
    %c0_24 = arith.constant 0 : index
    %44 = vector.load %arg10[%c0_22, %c0_23, %c0_24] : memref<1x32x1024xbf16, #tpu.memory_space<vmem>>, vector<1x32x1024xbf16>
    %45 = vector.shape_cast %44 : vector<1x32x1024xbf16> to vector<32x1024xbf16>
    %46 = vector.shape_cast %43 : vector<32x1024xbf16> to vector<1x32x1024xbf16>
    tpu.vector_store %arg10[%c0_22, %c0_23, %c0_24], %46 {strides = array<i32>} : memref<1x32x1024xbf16, #tpu.memory_space<vmem>>, vector<1x32x1024xbf16>,
    return
  }
  func.func @transform_0(%arg0: i32, %arg1: i32) -> (i32, i32, i32) {
    %c0_i32 = arith.constant 0 : i32
    %c0_i32_0 = arith.constant 0 : i32
    return %arg0, %c0_i32, %arg1 : i32, i32, i32
  }
  func.func @transform_1(%arg0: i32, %arg1: i32) -> (i32, i32, i32) {
    %c0_i32 = arith.constant 0 : i32
    %c0_i32_0 = arith.constant 0 : i32
    return %arg0, %c0_i32, %arg1 : i32, i32, i32
  }
  func.func @transform_2(%arg0: i32, %arg1: i32) -> (i32, i32) {
    %c0_i32 = arith.constant 0 : i32
    %c0_i32_0 = arith.constant 0 : i32
    %c0_i32_1 = arith.constant 0 : i32
    return %c0_i32, %c0_i32_0 : i32, i32
  }
  func.func @transform_3(%arg0: i32, %arg1: i32) -> (i32, i32) {
    %c0_i32 = arith.constant 0 : i32
    %c0_i32_0 = arith.constant 0 : i32
    %c0_i32_1 = arith.constant 0 : i32
    return %c0_i32, %c0_i32_0 : i32, i32
  }
  func.func @transform_4(%arg0: i32, %arg1: i32) -> (i32, i32) {
    %c0_i32 = arith.constant 0 : i32
    %c0_i32_0 = arith.constant 0 : i32
    %c0_i32_1 = arith.constant 0 : i32
    return %c0_i32, %c0_i32_0 : i32, i32
  }
  func.func @transform_5(%arg0: i32, %arg1: i32) -> (i32, i32) {
    %c0_i32 = arith.constant 0 : i32
    %c0_i32_0 = arith.constant 0 : i32
    %c0_i32_1 = arith.constant 0 : i32
    return %c0_i32, %c0_i32_0 : i32, i32
  }
  func.func @transform_6(%arg0: i32, %arg1: i32) -> (i32, i32) {
    %c0_i32 = arith.constant 0 : i32
    %c0_i32_0 = arith.constant 0 : i32
    %c0_i32_1 = arith.constant 0 : i32
    return %c0_i32, %c0_i32_0 : i32, i32
  }
  func.func @transform_7(%arg0: i32, %arg1: i32) -> (i32, i32) {
    %c0_i32 = arith.constant 0 : i32
    %c0_i32_0 = arith.constant 0 : i32
    %c0_i32_1 = arith.constant 0 : i32
    return %c0_i32, %c0_i32_0 : i32, i32
  }
  func.func @transform_8(%arg0: i32, %arg1: i32) -> (i32, i32, i32) {
    %c0_i32 = arith.constant 0 : i32
    %c0_i32_0 = arith.constant 0 : i32
    return %arg0, %c0_i32, %arg1 : i32, i32, i32
  }
}

</mosaic_0001>

<bundles_post_ra>
// kernel: keypoint_encoder.1
= control target key start
LH: loop header
LB: loop body
LE: loop exit
PB: predicated region body
PF: predicated region fallthrough
CT: control target
= control target key end

     0   :  { %13 = vsyncpa [#allocation3], 0  ;;  %s2217_s0 = inlined_call_operand.vmem [shape: bf16[2,2,1024], index: 0, kind: input, shape index: {}]   ;;  %s2218_s1 = inlined_call_operand.vmem [shape: bf16[2,1,1024], index: 1, kind: input, shape index: {}]   ;;  %s2219_s2 = inlined_call_operand.vmem [shape: f32[16,3], index: 2, kind: input, shape index: {}]   ;;  %s2220_s3 = inlined_call_operand.vmem [shape: f32[16,1], index: 3, kind: input, shape index: {}]   ;;  %s2221_s4 = inlined_call_operand.vmem [shape: bf16[32,16], index: 4, kind: input, shape index: {}]   ;;  %s2222_s5 = inlined_call_operand.vmem [shape: f32[32,1], index: 5, kind: input, shape index: {}]   ;;  %s2223_s6 = inlined_call_operand.vmem [shape: bf16[32,32], index: 6, kind: input, shape index: {}]   ;;  %s2224_s7 = inlined_call_operand.vmem [shape: f32[32,1], index: 7, kind: input, shape index: {}]   ;;  %s2225_s8 = inlined_call_operand.hbm [shape: bf16[2,32,1024], index: 8, kind: output, shape index: {}]  }
   0x1   :  { %15 = vsyncpa [#allocation3 + $0x1], 0  ;;  %s1800_s27 = smov 0   ;;  %s1802_s28 = smov 0  }
   0x2   :  { %s1804_s29 = smov 0   ;;  %s1806_s30 = smov 0  }
   0x3   :  { %s1808_s9 = smov 0   ;;  %s1810_s10 = smov 0  }
   0x4 LB: > { %s1533_s11 = sadd.s32 4294967295, %s1747_s10   ;;  %s1534_s12 = sadd.s32 4294967294, %s1747_s10   ;;  %s1747_s10 = sphi %s1810_s10, %s21_s10   ;;  %s1743_s9 = sphi %s1808_s9, %s2232_s9   ;;  %s1739_s30 = sphi %s1806_s30, %s2231_s30   ;;  %s1735_s29 = sphi %s1804_s29, %s2230_s29   ;;  %s1731_s28 = sphi %s1802_s28, %s2229_s28   ;;  %s1727_s27 = sphi %s1800_s27, %s2228_s27  }
   0x5   : > { %s33_s13 = sadd.s32 1, %s1743_s9  ;;  %s224_s14 = sadd.s32 1, %s1735_s29 }
   0x6   : > { %p35_p0 = scmp.ge.s32.totalorder %s33_s13, 2  ;;  %p234_p1 = scmp.ne.s32.totalorder %s1735_s29, %s1731_s28 }
   0x7   : > { %p235_p2 = scmp.eq.s32.totalorder %s1533_s11, 1  ;;  %p240_p3 = scmp.ne.s32.totalorder %s1731_s28, %s1727_s27 }
   0x8   : > { %s2234_s13 = smov (%p35_p0, %s33_s13), 0  ;;  %p241_p5 = scmp.eq.s32.totalorder %s1534_s12, 1 }
   0x9   : > { %p1840_p4 = por %p235_p2, %p234_p1  ;;  %s219_s16 = ssub.s32 %s1743_s9, %s2234_s13 }
   0xa   : > { %p1537_p6 = scmp.ge.s32.totalorder %s1747_s10, 1  ;;  %p222_p7 = scmp.eq.s32.totalorder %s219_s16, 0 }
   0xb   : > { %p1847_p8 = por %p241_p5, %p240_p3  ;;  %p301_p9 = scmp.lt.s32.totalorder %s1747_s10, 3 }
   0xc   : > { %s1853_s18 = scalar_select %p222_p7, %s1735_s29, %s224_s14  }
   0xd   : > { %p302_p10 = pnand %p1537_p6, %p301_p9 }
   0xe   : > { %v368_v0 = vld [vmem:[%s2219_s2] sm:$0xff] (!%p302_p10)  ;;  %v1749_v1 = vmov (!%p302_p10), 1   ;;  %v1750_v2 = vmov (!%p302_p10), 0   ;;  %v369_v3 = vld [vmem:[%s2219_s2 + $0x8] sm:$0xff] (!%p302_p10)  ;;  %v1751_v4 = vmov (!%p302_p10), 2   ;;  %v758_v8 = vld [vmem:[%s2222_s5 + $0x10] sm:$0xff] (!%p302_p10)  ;;  %v384_v15 = vlaneseq (!%p302_p10) }
   0xf   : > { %305 = sbr.rel (%p302_p10) target bundleno = 660 (0x294), region = 52  ;;  %1660 = vset.pattern.permute.xlu1 (!%p302_p10), %v1749_v1  ;;  %1659 = vset.pattern.permute.xlu0 (!%p302_p10), %v1750_v2  ;;  %v700_v5 = vld [vmem:[%s2220_s3] sm:$0xff] (!%p302_p10)  ;;  %v701_v6 = vld [vmem:[%s2220_s3 + $0x8] sm:$0xff] (!%p302_p10)  ;;  %v759_v11 = vld [vmem:[%s2222_s5 + $0x18] sm:$0xff] (!%p302_p10)  ;;  %p347_p11 = scmp.lt.s32.totalorder (!%p302_p10), %s1739_s30, 1  ;;  %vm790_vm0 = vcmask (!%p302_p10), 130048  }
  0x10   : > { %473 = vperm.xlu1 (!%p302_p10), %1660, %v368_v0   ;;  %374 = vperm.xlu0 (!%p302_p10), %1659, %v368_v0   ;;  %v756_v7 = vld [vmem:[%s2222_s5] sm:$0xff] (!%p302_p10)  ;;  %v757_v9 = vld [vmem:[%s2222_s5 + $0x8] sm:$0xff] (!%p302_p10)  ;;  %v1063_v12 = vld [vmem:[%s2224_s7 + $0x10] sm:$0xff] (!%p302_p10)  ;;  %v385_v16 = vshrl.u32 (!%p302_p10), %v384_v15, 7  ;;  %vm1095_vm1 = vcmask (!%p302_p10), 261120  }
  0x11   : > { %829 = vmatprep.mubr.bf16.mxu0 (!%p302_p10), %v1750_v2  ;;  %882 = vmatprep.mubr.bf16.mxu1 (!%p302_p10), %v1750_v2  ;;  %v1061_v10 = vld [vmem:[%s2224_s7] sm:$0xff] (!%p302_p10)  ;;  %v1062_v13 = vld [vmem:[%s2224_s7 + $0x8] sm:$0xff] (!%p302_p10)  ;;  %v1064_v14 = vld [vmem:[%s2224_s7 + $0x18] sm:$0xff] (!%p302_p10) }
  0x12   : > { %v390_v19 = vsub.s32 (!%p302_p10), 2, %v385_v16  ;;  %v486_v21 = vsub.s32 (!%p302_p10), 3, %v385_v16  ;;  %v398_v23 = vsub.s32 (!%p302_p10), 6, %v385_v16  ;;  %v386_v24 = vsub.s32 (!%p302_p10), 0, %v385_v16 }
  0x13   : > { %v494_v25 = vsub.s32 (!%p302_p10), 7, %v385_v16  ;;  %v482_v26 = vsub.s32 (!%p302_p10), 1, %v385_v16  ;;  %v394_v35 = vsub.s32 (!%p302_p10), 4, %v385_v16  ;;  %v490_v36 = vsub.s32 (!%p302_p10), 5, %v385_v16 }
  0x14   : > { %477 = vperm.xlu1 (!%p302_p10), %1660, %v369_v3   ;;  %379 = vperm.xlu0 (!%p302_p10), %1659, %v369_v3  }
  0x16   : > { %s348_s19 = scalar_select %p347_p11, %s1739_s30, 1 }
  0x18   : > { %1662 = vset.pattern.permute.xlu1 %v1751_v4  ;;  %1661 = vset.pattern.permute.xlu0 %v1751_v4  ;;  %s1539_s20 = sshll.u32 %s348_s19, 3 }
  0x19   : > { %591 = vperm.xlu1 %1662, %v369_v3   ;;  %587 = vperm.xlu0 %1661, %v368_v0   ;;  %s353_s23 = scalar_lea.vmem %s2217_s0, %s1539_s20  ;;  %s362_s26 = scalar_lea.vmem %s2218_s1, %s1539_s20 }
  0x1a   : > { %v366_v17 = vld [vmem:[%s353_s23] sm:$0xff]  ;;  %s343_s23 = sand.u32 1, %s1731_s28   ;;  %s1752_s20 = smov [#allocation2]  }
  0x1b   : > { %v367_v18 = vld [vmem:[%s362_s26] sm:$0xff]  ;;  %v370_v20 = vunpack.c.l.bf16 %v366_v17  ;;  %v371_v37 = vunpack.c.h.bf16 %v366_v17  ;;  %s1538_s24 = sshll.u32 %s343_s23, 7  ;;  %s1598_s26 = sshll.u32 %s1739_s30, 11 }
  0x1c   : > { %v584_v22 = vunpack.c.l.bf16 %v367_v18  ;;  %v585_v38 = vunpack.c.h.bf16 %v367_v18  ;;  %s2128_s25 = scalar_lea.vmem [#allocation2], %s1538_s24  ;;  %s2162_s16 = scalar_lea.hbm %s2225_s8, %s1598_s26 }
  0x1d   : > { %1663 = vset.pattern.permute.xlu1 %v1750_v2  ;;  %1664 = vset.pattern.permute.xlu0 %v1750_v2  ;;  %v391_v27 = vrot.slane %v370_v20, %v390_v19  ;;  %v487_v28 = vrot.slane %v370_v20, %v486_v21  ;;  %v399_v30 = vrot.slane %v370_v20, %v398_v23  ;;  %s1442_s11 = sshll.u32 %s2128_s25, 4  ;;  %s2171_s30 = scalar_lea.sflag [#allocation3], %s343_s23  ;;  %s2164_s11 = int_to_ptr.vmem [resolvable:$true] %s1442_s11 }
  0x1e   : > { %704 = vperm.xlu1 %1663, %v700_v5   ;;  %709 = vperm.xlu0 %1664, %v701_v6   ;;  %v603_v29 = vrot.slane %v584_v22, %v390_v19  ;;  %v495_v31 = vrot.slane %v370_v20, %v494_v25  ;;  %v611_v32 = vrot.slane %v584_v22, %v398_v23  ;;  %s1669_s19 = scalar_lea.vmem %s2164_s11, 2048  ;;  %s1673_s21 = sshll.u32 %s1752_s20, 4  ;;  %s1674_s21 = int_to_ptr.vmem [resolvable:$false] %s1673_s21 }
  0x1f   : > { %v387_v33 = vrot.slane %v370_v20, %v386_v24  ;;  %v483_v34 = vrot.slane %v370_v20, %v482_v26  ;;  %v431_v39 = vrot.slane %v391_v27, %v386_v24  ;;  %v527_v40 = vrot.slane %v487_v28, %v482_v26  ;;  %p1670_p12 = scmp.ne.s32.totalorder %s2164_s11, %s1669_s19  ;;  %s1675_s22 = scalar_lea.vmem %s1674_s21, 4096 }
  0x20   : > { %v1904_v41 = vrot.slane %v603_v29, %v386_v24  ;;  %v439_v42 = vrot.slane %v399_v30, %v386_v24  ;;  %v535_v43 = vrot.slane %v495_v31, %v482_v26  ;;  %v1906_v44 = vrot.slane %v611_v32, %v386_v24  ;;  %p1676_p1 = scmp.lt.s32.totalorder %s2164_s11, %s1674_s21  ;;  %p1677_p2 = scmp.lt.s32.totalorder %s1675_s22, %s1669_s19 }
  0x21   : > { %v427_v45 = vrot.slane %v387_v33, %v386_v24  ;;  %v599_v46 = vrot.slane %v584_v22, %v386_v24  ;;  %v523_v47 = vrot.slane %v483_v34, %v482_v26  ;;  %v395_v48 = vrot.slane %v370_v20, %v394_v35  ;;  %p1671_p13 = pnand %p1670_p12, %p1840_p4 }
  0x22   : > { %762 = vperm.xlu1 %1663, %v756_v7   ;;  %772 = vperm.xlu0 %1664, %v758_v8   ;;  %v491_v49 = vrot.slane %v370_v20, %v490_v36  ;;  %v607_v50 = vrot.slane %v584_v22, %v394_v35  ;;  %v407_v51 = vrot.slane %v371_v37, %v390_v19  ;;  %p1678_p3 = por %p1677_p2, %p1676_p1 }
  0x23   : > { %v503_v52 = vrot.slane %v371_v37, %v486_v21  ;;  %v619_v53 = vrot.slane %v585_v38, %v390_v19  ;;  %v415_v54 = vrot.slane %v371_v37, %v398_v23  ;;  %v511_v55 = vrot.slane %v371_v37, %v494_v25  ;;  %p1672_p0 = pneg %p1671_p13 }
  0x24   : > { %v627_v56 = vrot.slane %v585_v38, %v398_v23  ;;  %v403_v57 = vrot.slane %v371_v37, %v386_v24  ;;  %v499_v58 = vrot.slane %v371_v37, %v482_v26  ;;  %v507_v59 = vrot.slane %v371_v37, %v490_v36 }
  0x25   : > { %v615_v60 = vrot.slane %v585_v38, %v386_v24  ;;  %v411_v61 = vrot.slane %v371_v37, %v394_v35  ;;  %v623_v62 = vrot.slane %v585_v38, %v394_v35  ;;  %v1908_v63 = vrot.slane %v599_v46, %v386_v24  ;;  %p1679_p5 = pnand %p1678_p3, %p1672_p0 }
  0x26   : > { %767 = vperm.xlu1 %1663, %v757_v9   ;;  %1067 = vperm.xlu0 %1664, %v1061_v10   ;;  %v435_v0 = vrot.slane %v395_v48, %v386_v24  ;;  %v531_v1 = vrot.slane %v491_v49, %v482_v26  ;;  %v647_v3 = vrot.slane %v607_v50, %v386_v24 }
  0x27   : > { %v447_v4 = vrot.slane %v407_v51, %v386_v24  ;;  %v543_v5 = vrot.slane %v503_v52, %v482_v26  ;;  %v1910_v6 = vrot.slane %v619_v53, %v386_v24  ;;  %v455_v7 = vrot.slane %v415_v54, %v386_v24 }
  0x28   : > { %v551_v8 = vrot.slane %v511_v55, %v482_v26  ;;  %v1912_v9 = vrot.slane %v627_v56, %v386_v24  ;;  %v1914_v10 = vrot.slane %v403_v57, %v386_v24  ;;  %v1924_v15 = vrot.slane %v411_v61, %v386_v24 }
  0x29   : > { %v1926_v16 = vrot.slane %v507_v59, %v482_v26  ;;  %v1928_v17 = vrot.slane %v623_v62, %v386_v24 }
  0x2a   : > { %777 = vperm.xlu1 %1663, %v759_v11   ;;  %1077 = vperm.xlu0 %1664, %v1063_v12   ;;  %v1916_v11 = vrot.slane %v499_v58, %v482_v26 }
  0x2e   : > { %1072 = vperm.xlu1 %1663, %v1062_v13  }
  0x32   : > { %1082 = vperm.xlu1 %1663, %v1064_v14   ;;  %v1922_v14 = vrot.slane %v615_v60, %v386_v24 }
  0x8f   : > { %v1918_v12 = vpop.permute.xlu1 %473  ;;  %v1920_v13 = vpop.permute.xlu0 %374 }
  0x90   : > { %v457_v18 = vmul.f32 %v431_v39, %v1920_v13  ;;  %v553_v19 = vmul.f32 %v527_v40, %v1918_v12  ;;  %v459_v20 = vmul.f32 %v439_v42, %v1920_v13  ;;  %v555_v21 = vmul.f32 %v535_v43, %v1918_v12 }
  0x91   : > { %v456_v22 = vmul.f32 %v427_v45, %v1920_v13  ;;  %v552_v23 = vmul.f32 %v523_v47, %v1918_v12  ;;  %v458_v25 = vmul.f32 %v435_v0, %v1920_v13  ;;  %v554_v27 = vmul.f32 %v531_v1, %v1918_v12 }
  0x92   : > { %v569_v26 = vadd.f32 %v553_v19, %v457_v18  ;;  %v571_v28 = vadd.f32 %v555_v21, %v459_v20  ;;  %v461_v24 = vmul.f32 %v447_v4, %v1920_v13  ;;  %v557_v29 = vmul.f32 %v543_v5, %v1918_v12 }
  0x93   : > { %v1940_v30 = vpop.permute.xlu1 %477  ;;  %v1942_v31 = vpop.permute.xlu0 %379  ;;  %v568_v32 = vadd.f32 %v552_v23, %v456_v22  ;;  %v570_v33 = vadd.f32 %v554_v27, %v458_v25  ;;  %v463_v34 = vmul.f32 %v455_v7, %v1920_v13  ;;  %v559_v35 = vmul.f32 %v551_v8, %v1918_v12 }
  0x94   : > { %v465_v36 = vmul.f32 %v431_v39, %v1942_v31  ;;  %v561_v37 = vmul.f32 %v527_v40, %v1940_v30  ;;  %v467_v38 = vmul.f32 %v439_v42, %v1942_v31  ;;  %v563_v46 = vmul.f32 %v535_v43, %v1940_v30 }
  0x95   : > { %v464_v48 = vmul.f32 %v427_v45, %v1942_v31  ;;  %v560_v49 = vmul.f32 %v523_v47, %v1940_v30  ;;  %v466_v50 = vmul.f32 %v435_v0, %v1942_v31  ;;  %v562_v51 = vmul.f32 %v531_v1, %v1940_v30 }
  0x96   : > { %v577_v52 = vadd.f32 %v561_v37, %v465_v36  ;;  %v579_v53 = vadd.f32 %v563_v46, %v467_v38  ;;  %v469_v54 = vmul.f32 %v447_v4, %v1942_v31  ;;  %v565_v39 = vmul.f32 %v543_v5, %v1940_v30 }
  0x97   : > { %v576_v55 = vadd.f32 %v560_v49, %v464_v48  ;;  %v578_v40 = vadd.f32 %v562_v51, %v466_v50  ;;  %v573_v56 = vadd.f32 %v557_v29, %v461_v24  ;;  %v471_v42 = vmul.f32 %v455_v7, %v1942_v31 }
  0x98   : > { %v1957_v43 = vpop.permute.xlu1 %591  ;;  %v1959_v45 = vpop.permute.xlu0 %587  ;;  %v581_v47 = vadd.f32 %v565_v39, %v469_v54  ;;  %v567_v57 = vmul.f32 %v551_v8, %v1940_v30  ;;  %v575_v58 = vadd.f32 %v559_v35, %v463_v34  ;;  %v1964_v59 = vmul.f32 %v1914_v10, %v1920_v13 }
  0x99   : > { %v669_v60 = vmul.f32 %v1904_v41, %v1959_v45  ;;  %v677_v61 = vmul.f32 %v1904_v41, %v1957_v43  ;;  %v671_v62 = vmul.f32 %v1906_v44, %v1959_v45  ;;  %v679_v0 = vmul.f32 %v1906_v44, %v1957_v43 }
  0x9a   : > { %v668_v1 = vmul.f32 %v1908_v63, %v1959_v45  ;;  %v676_v4 = vmul.f32 %v1908_v63, %v1957_v43  ;;  %v670_v5 = vmul.f32 %v647_v3, %v1959_v45  ;;  %v678_v7 = vmul.f32 %v647_v3, %v1957_v43 }
  0x9b   : > { %v685_v8 = vadd.f32 %v669_v60, %v569_v26  ;;  %v693_v18 = vadd.f32 %v677_v61, %v577_v52  ;;  %v687_v19 = vadd.f32 %v671_v62, %v571_v28  ;;  %v695_v41 = vadd.f32 %v679_v0, %v579_v53  ;;  %v1665_v62 = vld [vmem:[%s2221_s4] sm:$0xff]  }
  0x9c   : > { %v684_v20 = vadd.f32 %v668_v1, %v568_v32  ;;  %v692_v21 = vadd.f32 %v676_v4, %v576_v55  ;;  %v686_v22 = vadd.f32 %v670_v5, %v570_v33  ;;  %v694_v23 = vadd.f32 %v678_v7, %v578_v40 }
  0x9d   : > { %v1980_v25 = vpop.permute.xlu1 %704  ;;  %v1982_v44 = vpop.permute.xlu0 %709  ;;  %v673_v27 = vmul.f32 %v1910_v6, %v1959_v45  ;;  %v681_v63 = vmul.f32 %v1910_v6, %v1957_v43  ;;  %v583_v24 = vadd.f32 %v567_v57, %v471_v42  ;;  %v675_v3 = vmul.f32 %v1912_v9, %v1959_v45 }
  0x9e   : > { %v713_v26 = vadd.f32 %v1980_v25, %v685_v8  ;;  %v721_v28 = vadd.f32 %v1982_v44, %v693_v18  ;;  %v715_v29 = vadd.f32 %v1980_v25, %v687_v19  ;;  %v723_v32 = vadd.f32 %v1982_v44, %v695_v41 }
  0x9f   : > { %v712_v33 = vadd.f32 %v1980_v25, %v684_v20  ;;  %v720_v34 = vadd.f32 %v1982_v44, %v692_v21  ;;  %v714_v35 = vadd.f32 %v1980_v25, %v686_v22  ;;  %v722_v6 = vadd.f32 %v1982_v44, %v694_v23 }
  0xa0   : > { %v729_v36 = vmax.f32 %v713_v26, 0.0  ;;  %v737_v37 = vmax.f32 %v721_v28, 0.0  ;;  %v731_v38 = vmax.f32 %v715_v29, 0.0  ;;  %v739_v46 = vmax.f32 %v723_v32, 0.0 }
  0xa1   : > { %v728_v48 = vmax.f32 %v712_v33, 0.0  ;;  %v736_v49 = vmax.f32 %v720_v34, 0.0  ;;  %v730_v50 = vmax.f32 %v714_v35, 0.0  ;;  %v738_v51 = vmax.f32 %v722_v6, 0.0 }
  0xa2   : > { %v745_v52 = vpack.c.bf16 %v737_v37, %v729_v36  ;;  %v747_v53 = vpack.c.bf16 %v739_v46, %v731_v38  ;;  %v689_v54 = vadd.f32 %v673_v27, %v573_v56  ;;  %v697_v39 = vadd.f32 %v681_v63, %v581_v47 }
  0xa3   : > { %v744_v55 = vpack.c.bf16 %v736_v49, %v728_v48  ;;  %v746_v40 = vpack.c.bf16 %v738_v51, %v730_v50  ;;  %v683_v42 = vmul.f32 %v1912_v9, %v1957_v43  ;;  %v691_v57 = vadd.f32 %v675_v3, %v575_v58  ;;  %v1666_v3 = vld [vmem:[%s2221_s4 + $0x8] sm:$0xff]  }
  0xa4   : > { %797 = vmatprep.subr.bf16.mxu0 %v745_v52  ;;  %850 = vmatprep.subr.bf16.mxu1 %v747_v53  ;;  %v717_v60 = vadd.f32 %v1980_v25, %v689_v54  ;;  %v725_v61 = vadd.f32 %v1982_v44, %v697_v39  ;;  %v468_v56 = vmul.f32 %v1914_v10, %v1942_v31 }
  0xa5   : > { %798 = vmatpush1.bf16.msra.mxu0 %v744_v55  ;;  %851 = vmatpush1.bf16.msra.mxu1 %v746_v40  ;;  %v699_v47 = vadd.f32 %v683_v42, %v583_v24  ;;  %v719_v0 = vadd.f32 %v1980_v25, %v691_v57  ;;  %v556_v9 = vmul.f32 %v1916_v11, %v1918_v12 }
  0xa6   : > { %v733_v58 = vmax.f32 %v717_v60, 0.0  ;;  %v741_v1 = vmax.f32 %v725_v61, 0.0  ;;  %v564_v4 = vmul.f32 %v1916_v11, %v1940_v30  ;;  %v672_v5 = vmul.f32 %v1922_v14, %v1959_v45 }
  0xa7   : > { %v727_v7 = vadd.f32 %v1982_v44, %v699_v47  ;;  %v735_v10 = vmax.f32 %v719_v0, 0.0  ;;  %v572_v8 = vadd.f32 %v556_v9, %v1964_v59  ;;  %v680_v18 = vmul.f32 %v1922_v14, %v1957_v43  ;;  %v2065_v0 = vpop.permute.xlu0 %772 }
  0xa8   : > { %v749_v19 = vpack.c.bf16 %v741_v1, %v733_v58  ;;  %1543 = vmatmul.mubr.msk.bf16.vlgmr.msra.gmra.mrb[0].mxu0 %vm790_vm0, %v1665_v62  ;;  %1545 = vmatmul.mubr.msk.bf16.vlgmr.msra.gmra.mrb[0].mxu1 %vm790_vm0, %v1665_v62  ;;  %v580_v41 = vadd.f32 %v564_v4, %v468_v56  ;;  %v462_v11 = vmul.f32 %v1924_v15, %v1920_v13 }
  0xa9   : > { %v743_v20 = vmax.f32 %v727_v7, 0.0  ;;  %v688_v21 = vadd.f32 %v672_v5, %v572_v8  ;;  %v470_v22 = vmul.f32 %v1924_v15, %v1942_v31  ;;  %v558_v59 = vmul.f32 %v1926_v16, %v1918_v12  ;;  %839 = vmatprep.mubr.bf16.mxu0 %v1750_v2  ;;  %892 = vmatprep.mubr.bf16.mxu1 %v1750_v2 }
  0xaa   : > { %903 = vmatprep.subr.bf16.mxu0 %v749_v19  ;;  %v696_v14 = vadd.f32 %v680_v18, %v580_v41  ;;  %v566_v23 = vmul.f32 %v1926_v16, %v1940_v30  ;;  %v674_v13 = vmul.f32 %v1928_v17, %v1959_v45  ;;  %v682_v27 = vmul.f32 %v1928_v17, %v1957_v43 }
  0xab   : > { %v751_v63 = vpack.c.bf16 %v743_v20, %v735_v10  ;;  %v716_v15 = vadd.f32 %v1980_v25, %v688_v21  ;;  %v574_v31 = vadd.f32 %v558_v59, %v462_v11 }
  0xac   : > { %v724_v12 = vadd.f32 %v1982_v44, %v696_v14  ;;  %v582_v24 = vadd.f32 %v566_v23, %v470_v22 }
  0xad   : > { %956 = vmatprep.subr.bf16.mxu1 %v751_v63  ;;  %v732_v26 = vmax.f32 %v716_v15, 0.0  ;;  %v690_v16 = vadd.f32 %v674_v13, %v574_v31 }
  0xae   : > { %v740_v30 = vmax.f32 %v724_v12, 0.0  ;;  %v698_v28 = vadd.f32 %v682_v27, %v582_v24 }
  0xaf   : > { %v718_v45 = vadd.f32 %v1980_v25, %v690_v16  ;;  %v2053_v25 = vpop.permute.xlu1 %762 }
  0xb0   : > { %v748_v29 = vpack.c.bf16 %v740_v30, %v732_v26  ;;  %v726_v17 = vadd.f32 %v1982_v44, %v698_v28  ;;  %1544 = vmatmul.mubr.msk.bf16.gmra.mrb[4].mxu0 %vm790_vm0, %v1666_v3  ;;  %1546 = vmatmul.mubr.msk.bf16.gmra.mrb[4].mxu1 %vm790_vm0, %v1666_v3 }
  0xb1   : > { %v734_v43 = vmax.f32 %v718_v45, 0.0  ;;  %935 = vmatprep.mubr.bf16.mxu0 %v1750_v2  ;;  %988 = vmatprep.mubr.bf16.mxu1 %v1750_v2 }
  0xb2   : > { %904 = vmatpush1.bf16.msra.mxu0 %v748_v29  ;;  %v742_v32 = vmax.f32 %v726_v17, 0.0 }
  0xb3   : > { %v2055_v44 = vpop.permute.xlu1 %767 }
  0xb4   : > { %v750_v33 = vpack.c.bf16 %v742_v32, %v734_v43 }
  0xb6   : > { %957 = vmatpush1.bf16.msra.mxu1 %v750_v33 }
  0xb7   : > { %v2067_v9 = vpop.permute.xlu1 %777 }
  0xb8   : > { %1547 = vmatmul.mubr.msk.bf16.vlgmr.msra.gmra.mrb[8].mxu0 %vm790_vm0, %v1665_v62 }
  0xb9   : > { %1549 = vmatmul.mubr.msk.bf16.vlgmr.msra.gmra.mrb[8].mxu1 %vm790_vm0, %v1665_v62  ;;  %945 = vmatprep.mubr.bf16.mxu0 %v1750_v2 }
  0xba   : > { %998 = vmatprep.mubr.bf16.mxu1 %v1750_v2 }
  0xc0   : > { %1548 = vmatmul.mubr.msk.bf16.gmra.mrb[12].mxu0 %vm790_vm0, %v1666_v3 }
  0xc1   : > { %1550 = vmatmul.mubr.msk.bf16.gmra.mrb[12].mxu1 %vm790_vm0, %v1666_v3  ;;  %1134 = vmatprep.mubr.bf16.mxu0 %v1750_v2 }
  0xc2   : > { %1187 = vmatprep.mubr.bf16.mxu1 %v1750_v2 }
 0x17b   : > { %v831_v34 = vpop.f32.mrb[0].mxu0  ;;  %v884_v35 = vpop.f32.mrb[0].mxu1 }
 0x17c   : > { %v832_v6 = vadd.f32 %v831_v34, %v2053_v25  ;;  %v885_v36 = vadd.f32 %v884_v35, %v2053_v25  ;;  %v833_v37 = vpop.f32.mrb[1].mxu0  ;;  %v886_v38 = vpop.f32.mrb[1].mxu1 }
 0x17d   : > { %v834_v46 = vadd.f32 %v833_v37, %v2053_v25  ;;  %v887_v48 = vadd.f32 %v886_v38, %v2053_v25  ;;  %v835_v49 = vpop.f32.mrb[2].mxu0  ;;  %v888_v50 = vpop.f32.mrb[2].mxu1  ;;  %v2083_v38 = vld [vmem:[%s2223_s6] sm:$0xff]  }
 0x17e   : > { %v836_v51 = vadd.f32 %v835_v49, %v2055_v44  ;;  %v889_v52 = vadd.f32 %v888_v50, %v2055_v44  ;;  %v837_v53 = vpop.f32.mrb[3].mxu0  ;;  %v890_v54 = vpop.f32.mrb[3].mxu1  ;;  %v1009_v40 = vmax.f32 %v832_v6, 0.0  ;;  %v1011_v42 = vmax.f32 %v885_v36, 0.0 }
 0x17f   : > { %v838_v39 = vadd.f32 %v837_v53, %v2055_v44  ;;  %v891_v55 = vadd.f32 %v890_v54, %v2055_v44  ;;  %v1010_v61 = vmax.f32 %v834_v46, 0.0  ;;  %v1012_v62 = vmax.f32 %v887_v48, 0.0 }
 0x180   : > { %v1017_v57 = vmax.f32 %v836_v51, 0.0  ;;  %v1019_v60 = vmax.f32 %v889_v52, 0.0 }
 0x181   : > { %v1018_v56 = vmax.f32 %v838_v39, 0.0  ;;  %v1020_v47 = vmax.f32 %v891_v55, 0.0 }
 0x182   : > { %v1041_v58 = vpack.c.bf16 %v1017_v57, %v1009_v40  ;;  %v1043_v1 = vpack.c.bf16 %v1019_v60, %v1011_v42 }
 0x183   : > { %v1042_v4 = vpack.c.bf16 %v1018_v56, %v1010_v61  ;;  %v1044_v5 = vpack.c.bf16 %v1020_v47, %v1012_v62  ;;  %v841_v7 = vpop.f32.mrb[4].mxu0  ;;  %v894_v10 = vpop.f32.mrb[4].mxu1 }
 0x184   : > { %v842_v8 = vadd.f32 %v841_v7, %v2065_v0  ;;  %v895_v18 = vadd.f32 %v894_v10, %v2065_v0  ;;  %v843_v19 = vpop.f32.mrb[5].mxu0  ;;  %v896_v41 = vpop.f32.mrb[5].mxu1 }
 0x185   : > { %v844_v11 = vadd.f32 %v843_v19, %v2065_v0  ;;  %v897_v20 = vadd.f32 %v896_v41, %v2065_v0  ;;  %v845_v21 = vpop.f32.mrb[6].mxu0  ;;  %v898_v22 = vpop.f32.mrb[6].mxu1  ;;  %1102 = vmatprep.subr.bf16.mxu0 %v1042_v4  ;;  %1155 = vmatprep.subr.bf16.mxu1 %v1044_v5  ;;  %v1668_v19 = vld [vmem:[%s2223_s6 + $0x8] sm:$0xff]  }
 0x186   : > { %v846_v59 = vadd.f32 %v845_v21, %v2067_v9  ;;  %v899_v14 = vadd.f32 %v898_v22, %v2067_v9  ;;  %v847_v23 = vpop.f32.mrb[7].mxu0  ;;  %v900_v13 = vpop.f32.mrb[7].mxu1  ;;  %1103 = vmatpush1.bf16.msra.mxu0 %v1041_v58  ;;  %1156 = vmatpush1.bf16.msra.mxu1 %v1043_v1  ;;  %v1025_v15 = vmax.f32 %v842_v8, 0.0  ;;  %v1027_v31 = vmax.f32 %v895_v18, 0.0 }
 0x187   : > { %v848_v27 = vadd.f32 %v847_v23, %v2067_v9  ;;  %v901_v63 = vadd.f32 %v900_v13, %v2067_v9  ;;  %v1026_v3 = vmax.f32 %v844_v11, 0.0  ;;  %v1028_v26 = vmax.f32 %v897_v20, 0.0 }
 0x188   : > { %v1033_v12 = vmax.f32 %v846_v59, 0.0  ;;  %v1035_v24 = vmax.f32 %v899_v14, 0.0 }
 0x189   : > { %v1034_v16 = vmax.f32 %v848_v27, 0.0  ;;  %v1036_v30 = vmax.f32 %v901_v63, 0.0 }
 0x18a   : > { %v1049_v28 = vpack.c.bf16 %v1033_v12, %v1025_v15  ;;  %v1051_v45 = vpack.c.bf16 %v1035_v24, %v1027_v31 }
 0x18b   : > { %v1050_v29 = vpack.c.bf16 %v1034_v16, %v1026_v3  ;;  %v1052_v17 = vpack.c.bf16 %v1036_v30, %v1028_v26  ;;  %v937_v43 = vpop.f32.mrb[8].mxu0 }
 0x18c   : > { %v938_v32 = vadd.f32 %v937_v43, %v2053_v25  ;;  %v990_v33 = vpop.f32.mrb[8].mxu1  ;;  %v939_v34 = vpop.f32.mrb[9].mxu0 }
 0x18d   : > { %v991_v35 = vadd.f32 %v990_v33, %v2053_v25  ;;  %v940_v6 = vadd.f32 %v939_v34, %v2053_v25  ;;  %v992_v36 = vpop.f32.mrb[9].mxu1  ;;  %v941_v37 = vpop.f32.mrb[10].mxu0  ;;  %1104 = vmatprep.subr.bf16.mxu0 %v1050_v29  ;;  %1157 = vmatprep.subr.bf16.mxu1 %v1052_v17 }
 0x18e   : > { %v993_v46 = vadd.f32 %v992_v36, %v2053_v25  ;;  %v942_v48 = vadd.f32 %v941_v37, %v2055_v44  ;;  %v994_v49 = vpop.f32.mrb[10].mxu1  ;;  %v943_v50 = vpop.f32.mrb[11].mxu0  ;;  %1105 = vmatpush1.bf16.msra.mxu0 %v1049_v28  ;;  %1158 = vmatpush1.bf16.msra.mxu1 %v1051_v45  ;;  %v1013_v54 = vmax.f32 %v938_v32, 0.0 }
 0x18f   : > { %v995_v51 = vadd.f32 %v994_v49, %v2055_v44  ;;  %v944_v52 = vadd.f32 %v943_v50, %v2055_v44  ;;  %v996_v53 = vpop.f32.mrb[11].mxu1  ;;  %v1015_v40 = vmax.f32 %v991_v35, 0.0  ;;  %v1014_v42 = vmax.f32 %v940_v6, 0.0  ;;  %v2120_v28 = vpop.permute.xlu1 %1072 }
 0x190   : > { %v1021_v39 = vmax.f32 %v942_v48, 0.0  ;;  %v997_v55 = vadd.f32 %v996_v53, %v2055_v44  ;;  %v1016_v60 = vmax.f32 %v993_v46, 0.0 }
 0x191   : > { %v1023_v57 = vmax.f32 %v995_v51, 0.0  ;;  %v1022_v25 = vmax.f32 %v944_v52, 0.0  ;;  %1553 = vmatmul.mubr.msk.bf16.vlgmr.msra.gmra.mrb[16].mxu0 %vm1095_vm1, %v2083_v38  ;;  %1555 = vmatmul.mubr.msk.bf16.vlgmr.msra.gmra.mrb[16].mxu1 %vm1095_vm1, %v2083_v38 }
 0x192   : > { %v1045_v61 = vpack.c.bf16 %v1021_v39, %v1013_v54  ;;  %v1024_v62 = vmax.f32 %v997_v55, 0.0  ;;  %1144 = vmatprep.mubr.bf16.mxu0 %v1750_v2  ;;  %1197 = vmatprep.mubr.bf16.mxu1 %v1750_v2 }
 0x193   : > { %v1047_v56 = vpack.c.bf16 %v1023_v57, %v1015_v40  ;;  %v1046_v47 = vpack.c.bf16 %v1022_v25, %v1014_v42  ;;  %v947_v44 = vpop.f32.mrb[12].mxu0  ;;  %v2132_v39 = vpop.permute.xlu1 %1082 }
 0x194   : > { %v1048_v58 = vpack.c.bf16 %v1024_v62, %v1016_v60  ;;  %v948_v1 = vadd.f32 %v947_v44, %v2065_v0  ;;  %v1000_v4 = vpop.f32.mrb[12].mxu1  ;;  %v949_v5 = vpop.f32.mrb[13].mxu0 }
 0x195   : > { %v1001_v7 = vadd.f32 %v1000_v4, %v2065_v0  ;;  %v950_v10 = vadd.f32 %v949_v5, %v2065_v0  ;;  %v1002_v8 = vpop.f32.mrb[13].mxu1  ;;  %v951_v18 = vpop.f32.mrb[14].mxu0  ;;  %1208 = vmatprep.subr.bf16.mxu0 %v1046_v47 }
 0x196   : > { %v1003_v41 = vadd.f32 %v1002_v8, %v2065_v0  ;;  %v952_v11 = vadd.f32 %v951_v18, %v2067_v9  ;;  %v1004_v20 = vpop.f32.mrb[14].mxu1  ;;  %1261 = vmatprep.subr.bf16.mxu1 %v1048_v58  ;;  %v953_v21 = vpop.f32.mrb[15].mxu0  ;;  %1209 = vmatpush1.bf16.msra.mxu0 %v1045_v61  ;;  %v1029_v23 = vmax.f32 %v948_v1, 0.0 }
 0x197   : > { %v1005_v22 = vadd.f32 %v1004_v20, %v2067_v9  ;;  %v954_v59 = vadd.f32 %v953_v21, %v2067_v9  ;;  %v1006_v14 = vpop.f32.mrb[15].mxu1  ;;  %1262 = vmatpush1.bf16.msra.mxu1 %v1047_v56  ;;  %v1031_v63 = vmax.f32 %v1001_v7, 0.0  ;;  %v1030_v15 = vmax.f32 %v950_v10, 0.0 }
 0x198   : > { %v1037_v13 = vmax.f32 %v952_v11, 0.0  ;;  %v1007_v27 = vadd.f32 %v1006_v14, %v2067_v9  ;;  %v1032_v12 = vmax.f32 %v1003_v41, 0.0  ;;  %v1068_v9 = vpop.permute.xlu0 %1067 }
 0x199   : > { %v1039_v31 = vmax.f32 %v1005_v22, 0.0  ;;  %v1038_v0 = vmax.f32 %v954_v59, 0.0  ;;  %1554 = vmatmul.mubr.msk.bf16.gmra.mrb[20].mxu0 %vm1095_vm1, %v1668_v19  ;;  %1556 = vmatmul.mubr.msk.bf16.gmra.mrb[20].mxu1 %vm1095_vm1, %v1668_v19 }
 0x19a   : > { %v1053_v24 = vpack.c.bf16 %v1037_v13, %v1029_v23  ;;  %v1040_v3 = vmax.f32 %v1007_v27, 0.0  ;;  %1240 = vmatprep.mubr.bf16.mxu0 %v1750_v2  ;;  %1293 = vmatprep.mubr.bf16.mxu1 %v1750_v2 }
 0x19b   : > { %v1055_v26 = vpack.c.bf16 %v1039_v31, %v1031_v63  ;;  %v1054_v16 = vpack.c.bf16 %v1038_v0, %v1030_v15 }
 0x19c   : > { %v1056_v30 = vpack.c.bf16 %v1040_v3, %v1032_v12  ;;  %v1078_v54 = vpop.permute.xlu0 %1077 }
 0x19d   : > { %1210 = vmatprep.subr.bf16.mxu0 %v1054_v16 }
 0x19e   : > { %1263 = vmatprep.subr.bf16.mxu1 %v1056_v30  ;;  %1211 = vmatpush1.bf16.msra.mxu0 %v1053_v24 }
 0x19f   : > { %1264 = vmatpush1.bf16.msra.mxu1 %v1055_v26 }
 0x1a1   : > { %1557 = vmatmul.mubr.msk.bf16.vlgmr.msra.gmra.mrb[24].mxu0 %vm1095_vm1, %v2083_v38 }
 0x1a2   : > { %1559 = vmatmul.mubr.msk.bf16.vlgmr.msra.gmra.mrb[24].mxu1 %vm1095_vm1, %v2083_v38  ;;  %1250 = vmatprep.mubr.bf16.mxu0 %v1750_v2 }
 0x1a3   : > { %1303 = vmatprep.mubr.bf16.mxu1 %v1750_v2 }
 0x1a9   : > { %1558 = vmatmul.mubr.msk.bf16.gmra.mrb[28].mxu0 %vm1095_vm1, %v1668_v19 }
 0x1aa   : > { %1560 = vmatmul.mubr.msk.bf16.gmra.mrb[28].mxu1 %vm1095_vm1, %v1668_v19 }
 0x264   : > { %v1136_v45 = vpop.f32.mrb[16].mxu0  ;;  %v1189_v29 = vpop.f32.mrb[16].mxu1 }
 0x265   : > { %v1137_v17 = vadd.f32 %v1136_v45, %v1068_v9  ;;  %v1190_v43 = vadd.f32 %v1189_v29, %v1068_v9  ;;  %v1138_v32 = vpop.f32.mrb[17].mxu0  ;;  %v1191_v33 = vpop.f32.mrb[17].mxu1 }
 0x266   : > { %v1139_v34 = vadd.f32 %v1138_v32, %v1068_v9  ;;  %v1192_v35 = vadd.f32 %v1191_v33, %v1068_v9  ;;  %v1140_v6 = vpop.f32.mrb[18].mxu0  ;;  %v1193_v2 = vpop.f32.mrb[18].mxu1 }
 0x267   : > { %v1141_v36 = vadd.f32 %v1140_v6, %v2120_v28  ;;  %v1194_v37 = vadd.f32 %v1193_v2, %v2120_v28  ;;  %v1142_v38 = vpop.f32.mrb[19].mxu0  ;;  %v1195_v46 = vpop.f32.mrb[19].mxu1 }
 0x268   : > { %v1582_v48 = vpack.c.bf16 %v1139_v34, %v1137_v17  ;;  %v1583_v49 = vpack.c.bf16 %v1192_v35, %v1190_v43  ;;  %v1143_v50 = vadd.f32 %v1142_v38, %v2120_v28  ;;  %v1196_v51 = vadd.f32 %v1195_v46, %v2120_v28 }
 0x26a   : > { %1410 = vst [vmem:[%s2128_s25] sm:$0xff] %v1582_v48  ;;  %1411 = vst [vmem:[%s2128_s25 + $0x8] sm:$0xff] %v1583_v49  ;;  %v1586_v52 = vpack.c.bf16 %v1143_v50, %v1141_v36  ;;  %v1587_v53 = vpack.c.bf16 %v1196_v51, %v1194_v37 }
 0x26c   : > { %1414 = vst [vmem:[%s2128_s25 + $0x20] sm:$0xff] %v1586_v52  ;;  %1415 = vst [vmem:[%s2128_s25 + $0x28] sm:$0xff] %v1587_v53  ;;  %v1146_v55 = vpop.f32.mrb[20].mxu0  ;;  %v1199_v40 = vpop.f32.mrb[20].mxu1 }
 0x26d   : > { %v1147_v42 = vadd.f32 %v1146_v55, %v1078_v54  ;;  %v1200_v57 = vadd.f32 %v1199_v40, %v1078_v54  ;;  %v1148_v25 = vpop.f32.mrb[21].mxu0  ;;  %v1201_v60 = vpop.f32.mrb[21].mxu1 }
 0x26e   : > { %v1149_v61 = vadd.f32 %v1148_v25, %v1078_v54  ;;  %v1202_v62 = vadd.f32 %v1201_v60, %v1078_v54  ;;  %v1150_v56 = vpop.f32.mrb[22].mxu0  ;;  %v1203_v47 = vpop.f32.mrb[22].mxu1 }
 0x26f   : > { %v1151_v44 = vadd.f32 %v1150_v56, %v2132_v39  ;;  %v1204_v58 = vadd.f32 %v1203_v47, %v2132_v39  ;;  %v1152_v1 = vpop.f32.mrb[23].mxu0  ;;  %v1205_v4 = vpop.f32.mrb[23].mxu1 }
 0x270   : > { %v1590_v5 = vpack.c.bf16 %v1149_v61, %v1147_v42  ;;  %v1591_v7 = vpack.c.bf16 %v1202_v62, %v1200_v57  ;;  %v1153_v10 = vadd.f32 %v1152_v1, %v2132_v39  ;;  %v1206_v8 = vadd.f32 %v1205_v4, %v2132_v39 }
 0x272   : > { %1418 = vst [vmem:[%s2128_s25 + $0x40] sm:$0xff] %v1590_v5  ;;  %1419 = vst [vmem:[%s2128_s25 + $0x48] sm:$0xff] %v1591_v7  ;;  %v1594_v18 = vpack.c.bf16 %v1153_v10, %v1151_v44  ;;  %v1595_v19 = vpack.c.bf16 %v1206_v8, %v1204_v58 }
 0x274   : > { %1422 = vst [vmem:[%s2128_s25 + $0x60] sm:$0xff] %v1594_v18  ;;  %1423 = vst [vmem:[%s2128_s25 + $0x68] sm:$0xff] %v1595_v19  ;;  %v1242_v41 = vpop.f32.mrb[24].mxu0 }
 0x275   : > { %v1243_v11 = vadd.f32 %v1242_v41, %v1068_v9  ;;  %v1295_v20 = vpop.f32.mrb[24].mxu1  ;;  %v1244_v21 = vpop.f32.mrb[25].mxu0 }
 0x276   : > { %v1296_v22 = vadd.f32 %v1295_v20, %v1068_v9  ;;  %v1245_v59 = vadd.f32 %v1244_v21, %v1068_v9  ;;  %v1297_v14 = vpop.f32.mrb[25].mxu1  ;;  %v1246_v23 = vpop.f32.mrb[26].mxu0 }
 0x277   : > { %v1298_v13 = vadd.f32 %v1297_v14, %v1068_v9  ;;  %v1247_v27 = vadd.f32 %v1246_v23, %v2120_v28  ;;  %v1299_v63 = vpop.f32.mrb[26].mxu1  ;;  %v1248_v15 = vpop.f32.mrb[27].mxu0 }
 0x278   : > { %v1584_v31 = vpack.c.bf16 %v1245_v59, %v1243_v11  ;;  %v1300_v0 = vadd.f32 %v1299_v63, %v2120_v28  ;;  %v1249_v12 = vadd.f32 %v1248_v15, %v2120_v28  ;;  %v1301_v24 = vpop.f32.mrb[27].mxu1 }
 0x279   : > { %v1585_v3 = vpack.c.bf16 %v1298_v13, %v1296_v22  ;;  %v1302_v26 = vadd.f32 %v1301_v24, %v2120_v28 }
 0x27a   : > { %1412 = vst [vmem:[%s2128_s25 + $0x10] sm:$0xff] %v1584_v31  ;;  %v1588_v16 = vpack.c.bf16 %v1249_v12, %v1247_v27 }
 0x27b   : > { %1413 = vst [vmem:[%s2128_s25 + $0x18] sm:$0xff] %v1585_v3  ;;  %v1589_v30 = vpack.c.bf16 %v1302_v26, %v1300_v0 }
 0x27c   : > { %1416 = vst [vmem:[%s2128_s25 + $0x30] sm:$0xff] %v1588_v16  ;;  %v1252_v9 = vpop.f32.mrb[28].mxu0 }
 0x27d   : > { %1417 = vst [vmem:[%s2128_s25 + $0x38] sm:$0xff] %v1589_v30  ;;  %v1253_v45 = vadd.f32 %v1252_v9, %v1078_v54  ;;  %v1305_v29 = vpop.f32.mrb[28].mxu1  ;;  %v1254_v17 = vpop.f32.mrb[29].mxu0 }
 0x27e   : > { %v1306_v43 = vadd.f32 %v1305_v29, %v1078_v54  ;;  %v1255_v32 = vadd.f32 %v1254_v17, %v1078_v54  ;;  %v1307_v33 = vpop.f32.mrb[29].mxu1  ;;  %v1256_v34 = vpop.f32.mrb[30].mxu0 }
 0x27f   : > { %v1308_v35 = vadd.f32 %v1307_v33, %v1078_v54  ;;  %v1257_v28 = vadd.f32 %v1256_v34, %v2132_v39  ;;  %v1309_v6 = vpop.f32.mrb[30].mxu1  ;;  %v1258_v2 = vpop.f32.mrb[31].mxu0 }
 0x280   : > { %v1592_v36 = vpack.c.bf16 %v1255_v32, %v1253_v45  ;;  %v1310_v37 = vadd.f32 %v1309_v6, %v2132_v39  ;;  %v1259_v38 = vadd.f32 %v1258_v2, %v2132_v39  ;;  %v1311_v46 = vpop.f32.mrb[31].mxu1 }
 0x281   : > { %v1593_v48 = vpack.c.bf16 %v1308_v35, %v1306_v43  ;;  %v1312_v49 = vadd.f32 %v1311_v46, %v2132_v39 }
 0x282   : > { %1420 = vst [vmem:[%s2128_s25 + $0x50] sm:$0xff] %v1592_v36  ;;  %v1596_v50 = vpack.c.bf16 %v1259_v38, %v1257_v28 }
 0x283   : > { %1421 = vst [vmem:[%s2128_s25 + $0x58] sm:$0xff] %v1593_v48  ;;  %v1597_v51 = vpack.c.bf16 %v1312_v49, %v1310_v37 }
 0x284   : > { %1424 = vst [vmem:[%s2128_s25 + $0x70] sm:$0xff] %v1596_v50 }
 0x285   : > { %1425 = vst [vmem:[%s2128_s25 + $0x78] sm:$0xff] %v1597_v51 }
 0x286   : > { %1682 = shalt.err (!%p1679_p5)
}
 0x287   : > { %s1683_s23 = scalar_lea.hbm %s2162_s16, 2048  ;;  %s1687_s26 = scalar_lea.hbm %s2225_s8, 4096 }
 0x288   : > { %p1684_p6 = scmp.ne.s32.totalorder %s2162_s16, %s1683_s23  ;;  %p1688_p10 = scmp.lt.u32.totalorder %s2162_s16, %s2225_s8 }
 0x289   : > { %p1689_p11 = scmp.lt.u32.totalorder %s1687_s26, %s1683_s23  ;;  %p1691_p13 = scmp.lt.u32.totalorder %s1683_s23, %s2162_s16 }
 0x28a   : > { %p1685_p7 = pnand %p1684_p6, %p1840_p4 }
 0x28b   : > { %p1690_p12 = por %p1689_p11, %p1688_p10 }
 0x28c   : > { %p1686_p9 = pneg %p1685_p7 }
 0x28d   : > { %p1692_p0 = por %p1691_p13, %p1690_p12 }
 0x28f   : > { %p1693_p1 = pnand %p1692_p0, %p1686_p9 }
 0x291   : > { %1696 = shalt.err (!%p1693_p1)
}
 0x292   : > { %s1753_s19 = smov 512   ;;  %s1754_s20 = smov 32  }
 0x293   : > { %1599 = dma.vmem_to_hbm [thread:$0]  (%p1840_p4), %s2164_s11, 2048, %s2162_s16, %s2171_s30, %s1753_s19, %s1753_s19, %s1754_s20  }
 0x294 PF: > { %p1605_p2 = scmp.ge.s32.totalorder %s1747_s10, 2  ;;  %s1457_s21 = sand.u32 1, %s1727_s27  }
 0x295   : > { %s1458_s22 = scalar_lea.sflag [#allocation3], %s1457_s21 }
 0x296   : > { %p1602_p3 = pnand %p1605_p2, %p1847_p8 }
 0x298   : > { %1722 = dma.done.wait (!%p1602_p3), %s1458_s22, 2048  }
 0x299   : > { %1724 = vsyncadd (!%p1602_p3), %s1458_s22, 4294965248  ;;  %s21_s10 = sadd.s32 1, %s1747_s10   ;;  %s2228_s27 = smov %s1731_s28 }
 0x29a   : > { %p18_p5 = scmp.ge.s32.totalorder %s21_s10, 4   ;;  %s2229_s28 = smov %s1735_s29 }
 0x29b   : > { %s2230_s29 = smov %s1853_s18  ;;  %s2231_s30 = smov %s1743_s9 }
 0x29c   : > { %s2232_s9 = smov %s2234_s13  ;;  %20 = sbr.rel (!%p18_p5) target bundleno = 4 (0x4), region = 90 }
 0x2a3   :  { %1463 = vsyncpa [#allocation3], 1 }
 0x2a4   :  { %1465 = vsyncpa [#allocation3 + $0x1], 1 }

</bundles_post_ra>
